<compile_context>
chip_gen: v6e
topology: v6e:2x2x1
jax: 0.10.0
libtpu: 0.0.40
codegen_flags: <defaults>
</compile_context>

<pallas_src>
import functools

import jax
import jax.numpy as jnp
from jax import lax
from jax.experimental import pallas as pl
from jax.experimental.pallas import tpu as pltpu


def _mixed_conv_kernel(xp_ref, w_ref, out_ref, col_ref, *, H, W, TH, Cp):
    """One (batch, row-tile) grid step: in-kernel im2col + one MXU matmul.

    xp_ref : (H+2, W+2, Cp)  spatially + channel padded NHWC image (f32)
    w_ref  : (9*Cp, Cp)      folded effective 3x3 conv weight (rows: tap*Cp+ci)
    out_ref: (TH*W, Cp)      output rows of this tile (flattened spatial)
    col_ref: (TH*W, 9*Cp)    VMEM scratch holding the im2col block
    """
    r0 = pl.multiple_of(pl.program_id(1) * TH, TH)
    # Build the im2col block: each 3x3 tap becomes an 8-lane stripe of col.
    for t in range(9):
        dh, dw = divmod(t, 3)
        tap = xp_ref[pl.ds(r0 + dh, TH), pl.ds(dw, W), :]          # (TH, W, Cp)
        col_ref[:, t * Cp:(t + 1) * Cp] = tap.reshape(TH * W, Cp)
    # Single matmul: (TH*W, 9*Cp) x (9*Cp, Cp) -> (TH*W, Cp), f32 accumulation.
    out_ref[...] = jnp.dot(col_ref[...], w_ref[...],
                           preferred_element_type=jnp.float32
                           ).astype(out_ref.dtype)


class MixedOpPallas:
    """Mirrors MixedOp.__init__ filtering/renormalization + Pallas forward."""

    def __init__(self, C_in, C_out, weights, key):
        assert C_in == C_out, "skip/pool primitives require C_in == C_out"
        k = 0.1
        sum1 = sum(wv for _, wv in weights if wv > k)
        self.op_weights = tuple((name, float(wv) / sum1)
                                for name, wv in weights if wv > k)
        self.C = C_in
        self.Cp = max(8, -(-C_in // 8) * 8)   # channels padded to sublane mult.

        k1, k3 = jax.random.split(key)
        # Deterministic synthetic parameters (kaiming-ish scale).
        self.w1 = jax.random.normal(k1, (C_in, C_out), jnp.float32) * 0.3
        self.w3_hwio = jax.random.normal(k3, (3, 3, C_in, C_out),
                                         jnp.float32) * 0.1

        # ---- Fold every selected (linear) primitive into ONE effective 3x3
        # conv weight, with the renormalized arch weights pre-scaled in. ----
        eye = jnp.eye(C_in, dtype=jnp.float32)
        w_eff = jnp.zeros((3, 3, C_in, C_out), jnp.float32)   # (kh, kw, ci, co)
        for name, a in self.op_weights:
            if name == 'skip_connect':
                w_eff = w_eff.at[1, 1].add(a * eye)
            elif name == 'avg_pool_3x3':
                w_eff = w_eff + (a / 9.0) * eye[None, None]
            elif name == 'conv_1x1':
                w_eff = w_eff.at[1, 1].add(a * self.w1)
            elif name == 'conv_3x3':
                w_eff = w_eff + a * self.w3_hwio
            else:
                raise ValueError(f"unknown primitive {name}")
        # Embed into padded channels and stack taps: row index = tap*Cp + ci.
        w_pad = jnp.zeros((3, 3, self.Cp, self.Cp), jnp.float32)
        w_pad = w_pad.at[:, :, :C_in, :C_out].set(w_eff)
        self.w_mat = w_pad.reshape(9 * self.Cp, self.Cp)

    def __call__(self, x_nchw):
        N, C, H, W = x_nchw.shape
        assert C == self.C
        Cp = self.Cp
        TH = 8 if H % 8 == 0 else H          # row tile -> (batch, row) grid
        n_row_tiles = H // TH

        # NCHW -> NHWC, spatial pad 1, channel pad to Cp (one fused XLA copy).
        x_nhwc = jnp.transpose(x_nchw, (0, 2, 3, 1))
        xpad = jnp.pad(x_nhwc, ((0, 0), (1, 1), (1, 1), (0, Cp - C)))

        kernel = functools.partial(_mixed_conv_kernel, H=H, W=W, TH=TH, Cp=Cp)

        flops = 2 * N * H * W * (9 * Cp) * Cp
        bytes_accessed = (xpad.size + self.w_mat.size + N * H * W * Cp) * 4

        out_flat = pl.pallas_call(
            kernel,
            out_shape=jax.ShapeDtypeStruct((N, H * W, Cp), jnp.float32),
            grid_spec=pltpu.PrefetchScalarGridSpec(
                num_scalar_prefetch=0,
                grid=(N, n_row_tiles),
                in_specs=[
                    # Full padded image per batch element (halo rows included);
                    # block index constant along the row-tile axis.
                    pl.BlockSpec((pl.Squeezed(), H + 2, W + 2, Cp),
                                 lambda n, r: (n, 0, 0, 0)),
                    # Folded weight: resident, constant block.
                    pl.BlockSpec((9 * Cp, Cp), lambda n, r: (0, 0)),
                ],
                out_specs=pl.BlockSpec((pl.Squeezed(), TH * W, Cp),
                                       lambda n, r: (n, r, 0)),
                scratch_shapes=[pltpu.VMEM((TH * W, 9 * Cp), jnp.float32)],
            ),
            compiler_params=pltpu.CompilerParams(
                dimension_semantics=("parallel", "parallel")),
            cost_estimate=pl.CostEstimate(flops=flops, transcendentals=0,
                                          bytes_accessed=bytes_accessed),
        )(xpad, self.w_mat)

        out = out_flat.reshape(N, H, W, Cp)[..., :C]
        return jnp.transpose(out, (0, 3, 1, 2))      # back to NCHW


# ----------------------------------------------------------------------------
# Pure-JAX reference (per-op, unfused) used only to sanity-check the kernel.
# ----------------------------------------------------------------------------
def _reference(mixed, x_nchw):
    x = jnp.transpose(x_nchw, (0, 2, 3, 1))  # NHWC
    out = jnp.zeros_like(x)
    for name, w in mixed.op_weights:
        if name == 'skip_connect':
            y = x
        elif name == 'avg_pool_3x3':
            y = lax.reduce_window(x, 0.0, lax.add, (1, 3, 3, 1),
                                  (1, 1, 1, 1), 'SAME') / 9.0
        elif name == 'conv_1x1':
            y = lax.conv_general_dilated(
                x, mixed.w1[None, None], (1, 1), 'SAME',
                dimension_numbers=('NHWC', 'HWIO', 'NHWC'),
                precision=lax.Precision.HIGHEST)
        elif name == 'conv_3x3':
            y = lax.conv_general_dilated(
                x, mixed.w3_hwio, (1, 1), 'SAME',
                dimension_numbers=('NHWC', 'HWIO', 'NHWC'),
                precision=lax.Precision.HIGHEST)
        out = out + w * y
    return jnp.transpose(out, (0, 3, 1, 2))


if __name__ == "__main__":
    key = jax.random.PRNGKey(0)
    kx, kp = jax.random.split(key)

    N, C, H, W = 2, 4, 16, 16
    x = jax.random.normal(kx, (N, C, H, W), jnp.float32)  # NCHW like PyTorch

    # Architecture weights: (primitive, alpha); k=0.1 filter keeps all four.
    arch_weights = [('conv_3x3', 0.35), ('conv_1x1', 0.25),
                    ('skip_connect', 0.20), ('avg_pool_3x3', 0.20)]

    mixed = MixedOpPallas(C, C, arch_weights, kp)

    out = mixed(x)
    out = jax.block_until_ready(out)

    ref = _reference(mixed, x)
    assert out.shape == (N, C, H, W)
    assert jnp.allclose(out, ref, rtol=1e-4, atol=1e-4), "mismatch vs reference"

    print("KERNEL_OK")
</pallas_src>

<mosaic_0001>
module attributes {stable_mosaic.version = 11 : i64} {
  func.func @_mixed_conv_kernel(%arg0: i32, %arg1: i32, %arg2: memref<1x18x18x8xf32, #tpu.memory_space<vmem>>, %arg3: memref<72x8xf32, #tpu.memory_space<vmem>>, %arg4: memref<1x128x8xf32, #tpu.memory_space<vmem>>, %arg5: memref<128x72xf32, #tpu.memory_space<vmem>>) attributes {dimension_semantics = [#tpu.dimension_semantics<parallel>, #tpu.dimension_semantics<parallel>], iteration_bounds = array<i64: 2, 2>, scalar_prefetch = 0 : i64, scratch_operands = 1 : i64, tpu.core_type = #tpu.core_type<tc>, window_params = [{transform_indices = @transform_0, window_bounds = array<i64: 1, 18, 18, 8>}, {pipeline_mode = #tpu.pipeline_mode<synchronous>, transform_indices = @transform_1, window_bounds = array<i64: 72, 8>}, {transform_indices = @transform_2, window_bounds = array<i64: 1, 128, 8>}]} {
    %c8_i32 = arith.constant 8 : i32
    %0 = arith.muli %arg1, %c8_i32 : i32
    %1 = tpu.assume_multiple %0, 8 : i32
    %c0_i32 = arith.constant 0 : i32
    %2 = arith.addi %1, %c0_i32 : i32
    %c0 = arith.constant 0 : index
    %3 = arith.index_cast %2 : i32 to index
    %c0_0 = arith.constant 0 : index
    %c0_1 = arith.constant 0 : index
    %4 = vector.load %arg2[%c0, %3, %c0_0, %c0_1] : memref<1x18x18x8xf32, #tpu.memory_space<vmem>>, vector<1x8x16x8xf32>
    %5 = vector.shape_cast %4 : vector<1x8x16x8xf32> to vector<8x16x8xf32>
    %6 = vector.shape_cast %5 : vector<8x16x8xf32> to vector<128x8xf32>
    %c0_2 = arith.constant 0 : index
    %c0_3 = arith.constant 0 : index
    %7 = vector.load %arg5[%c0_2, %c0_3] : memref<128x72xf32, #tpu.memory_space<vmem>>, vector<128x8xf32>
    tpu.vector_store %arg5[%c0_2, %c0_3], %6 {strides = array<i32>} : memref<128x72xf32, #tpu.memory_space<vmem>>, vector<128x8xf32>,
    %c0_i32_4 = arith.constant 0 : i32
    %8 = arith.addi %1, %c0_i32_4 : i32
    %c0_5 = arith.constant 0 : index
    %9 = arith.index_cast %8 : i32 to index
    %c1 = arith.constant 1 : index
    %c0_6 = arith.constant 0 : index
    %10 = vector.load %arg2[%c0_5, %9, %c1, %c0_6] : memref<1x18x18x8xf32, #tpu.memory_space<vmem>>, vector<1x8x16x8xf32>
    %11 = vector.shape_cast %10 : vector<1x8x16x8xf32> to vector<8x16x8xf32>
    %12 = vector.shape_cast %11 : vector<8x16x8xf32> to vector<128x8xf32>
    %c0_7 = arith.constant 0 : index
    %c8 = arith.constant 8 : index
    %13 = vector.load %arg5[%c0_7, %c8] : memref<128x72xf32, #tpu.memory_space<vmem>>, vector<128x8xf32>
    tpu.vector_store %arg5[%c0_7, %c8], %12 {strides = array<i32>} : memref<128x72xf32, #tpu.memory_space<vmem>>, vector<128x8xf32>,
    %c0_i32_8 = arith.constant 0 : i32
    %14 = arith.addi %1, %c0_i32_8 : i32
    %c0_9 = arith.constant 0 : index
    %15 = arith.index_cast %14 : i32 to index
    %c2 = arith.constant 2 : index
    %c0_10 = arith.constant 0 : index
    %16 = vector.load %arg2[%c0_9, %15, %c2, %c0_10] : memref<1x18x18x8xf32, #tpu.memory_space<vmem>>, vector<1x8x16x8xf32>
    %17 = vector.shape_cast %16 : vector<1x8x16x8xf32> to vector<8x16x8xf32>
    %18 = vector.shape_cast %17 : vector<8x16x8xf32> to vector<128x8xf32>
    %c0_11 = arith.constant 0 : index
    %c16 = arith.constant 16 : index
    %19 = vector.load %arg5[%c0_11, %c16] : memref<128x72xf32, #tpu.memory_space<vmem>>, vector<128x8xf32>
    tpu.vector_store %arg5[%c0_11, %c16], %18 {strides = array<i32>} : memref<128x72xf32, #tpu.memory_space<vmem>>, vector<128x8xf32>,
    %c1_i32 = arith.constant 1 : i32
    %20 = arith.addi %1, %c1_i32 : i32
    %c0_12 = arith.constant 0 : index
    %21 = arith.index_cast %20 : i32 to index
    %c0_13 = arith.constant 0 : index
    %c0_14 = arith.constant 0 : index
    %22 = vector.load %arg2[%c0_12, %21, %c0_13, %c0_14] : memref<1x18x18x8xf32, #tpu.memory_space<vmem>>, vector<1x8x16x8xf32>
    %23 = vector.shape_cast %22 : vector<1x8x16x8xf32> to vector<8x16x8xf32>
    %24 = vector.shape_cast %23 : vector<8x16x8xf32> to vector<128x8xf32>
    %c0_15 = arith.constant 0 : index
    %c24 = arith.constant 24 : index
    %25 = vector.load %arg5[%c0_15, %c24] : memref<128x72xf32, #tpu.memory_space<vmem>>, vector<128x8xf32>
    tpu.vector_store %arg5[%c0_15, %c24], %24 {strides = array<i32>} : memref<128x72xf32, #tpu.memory_space<vmem>>, vector<128x8xf32>,
    %c1_i32_16 = arith.constant 1 : i32
    %26 = arith.addi %1, %c1_i32_16 : i32
    %c0_17 = arith.constant 0 : index
    %27 = arith.index_cast %26 : i32 to index
    %c1_18 = arith.constant 1 : index
    %c0_19 = arith.constant 0 : index
    %28 = vector.load %arg2[%c0_17, %27, %c1_18, %c0_19] : memref<1x18x18x8xf32, #tpu.memory_space<vmem>>, vector<1x8x16x8xf32>
    %29 = vector.shape_cast %28 : vector<1x8x16x8xf32> to vector<8x16x8xf32>
    %30 = vector.shape_cast %29 : vector<8x16x8xf32> to vector<128x8xf32>
    %c0_20 = arith.constant 0 : index
    %c32 = arith.constant 32 : index
    %31 = vector.load %arg5[%c0_20, %c32] : memref<128x72xf32, #tpu.memory_space<vmem>>, vector<128x8xf32>
    tpu.vector_store %arg5[%c0_20, %c32], %30 {strides = array<i32>} : memref<128x72xf32, #tpu.memory_space<vmem>>, vector<128x8xf32>,
    %c1_i32_21 = arith.constant 1 : i32
    %32 = arith.addi %1, %c1_i32_21 : i32
    %c0_22 = arith.constant 0 : index
    %33 = arith.index_cast %32 : i32 to index
    %c2_23 = arith.constant 2 : index
    %c0_24 = arith.constant 0 : index
    %34 = vector.load %arg2[%c0_22, %33, %c2_23, %c0_24] : memref<1x18x18x8xf32, #tpu.memory_space<vmem>>, vector<1x8x16x8xf32>
    %35 = vector.shape_cast %34 : vector<1x8x16x8xf32> to vector<8x16x8xf32>
    %36 = vector.shape_cast %35 : vector<8x16x8xf32> to vector<128x8xf32>
    %c0_25 = arith.constant 0 : index
    %c40 = arith.constant 40 : index
    %37 = vector.load %arg5[%c0_25, %c40] : memref<128x72xf32, #tpu.memory_space<vmem>>, vector<128x8xf32>
    tpu.vector_store %arg5[%c0_25, %c40], %36 {strides = array<i32>} : memref<128x72xf32, #tpu.memory_space<vmem>>, vector<128x8xf32>,
    %c2_i32 = arith.constant 2 : i32
    %38 = arith.addi %1, %c2_i32 : i32
    %c0_26 = arith.constant 0 : index
    %39 = arith.index_cast %38 : i32 to index
    %c0_27 = arith.constant 0 : index
    %c0_28 = arith.constant 0 : index
    %40 = vector.load %arg2[%c0_26, %39, %c0_27, %c0_28] : memref<1x18x18x8xf32, #tpu.memory_space<vmem>>, vector<1x8x16x8xf32>
    %41 = vector.shape_cast %40 : vector<1x8x16x8xf32> to vector<8x16x8xf32>
    %42 = vector.shape_cast %41 : vector<8x16x8xf32> to vector<128x8xf32>
    %c0_29 = arith.constant 0 : index
    %c48 = arith.constant 48 : index
    %43 = vector.load %arg5[%c0_29, %c48] : memref<128x72xf32, #tpu.memory_space<vmem>>, vector<128x8xf32>
    tpu.vector_store %arg5[%c0_29, %c48], %42 {strides = array<i32>} : memref<128x72xf32, #tpu.memory_space<vmem>>, vector<128x8xf32>,
    %c2_i32_30 = arith.constant 2 : i32
    %44 = arith.addi %1, %c2_i32_30 : i32
    %c0_31 = arith.constant 0 : index
    %45 = arith.index_cast %44 : i32 to index
    %c1_32 = arith.constant 1 : index
    %c0_33 = arith.constant 0 : index
    %46 = vector.load %arg2[%c0_31, %45, %c1_32, %c0_33] : memref<1x18x18x8xf32, #tpu.memory_space<vmem>>, vector<1x8x16x8xf32>
    %47 = vector.shape_cast %46 : vector<1x8x16x8xf32> to vector<8x16x8xf32>
    %48 = vector.shape_cast %47 : vector<8x16x8xf32> to vector<128x8xf32>
    %c0_34 = arith.constant 0 : index
    %c56 = arith.constant 56 : index
    %49 = vector.load %arg5[%c0_34, %c56] : memref<128x72xf32, #tpu.memory_space<vmem>>, vector<128x8xf32>
    tpu.vector_store %arg5[%c0_34, %c56], %48 {strides = array<i32>} : memref<128x72xf32, #tpu.memory_space<vmem>>, vector<128x8xf32>,
    %c2_i32_35 = arith.constant 2 : i32
    %50 = arith.addi %1, %c2_i32_35 : i32
    %c0_36 = arith.constant 0 : index
    %51 = arith.index_cast %50 : i32 to index
    %c2_37 = arith.constant 2 : index
    %c0_38 = arith.constant 0 : index
    %52 = vector.load %arg2[%c0_36, %51, %c2_37, %c0_38] : memref<1x18x18x8xf32, #tpu.memory_space<vmem>>, vector<1x8x16x8xf32>
    %53 = vector.shape_cast %52 : vector<1x8x16x8xf32> to vector<8x16x8xf32>
    %54 = vector.shape_cast %53 : vector<8x16x8xf32> to vector<128x8xf32>
    %c0_39 = arith.constant 0 : index
    %c64 = arith.constant 64 : index
    %55 = vector.load %arg5[%c0_39, %c64] : memref<128x72xf32, #tpu.memory_space<vmem>>, vector<128x8xf32>
    tpu.vector_store %arg5[%c0_39, %c64], %54 {strides = array<i32>} : memref<128x72xf32, #tpu.memory_space<vmem>>, vector<128x8xf32>,
    %c0_40 = arith.constant 0 : index
    %c0_41 = arith.constant 0 : index
    %56 = vector.load %arg5[%c0_40, %c0_41] : memref<128x72xf32, #tpu.memory_space<vmem>>, vector<128x72xf32>
    %c0_42 = arith.constant 0 : index
    %c0_43 = arith.constant 0 : index
    %57 = vector.load %arg3[%c0_42, %c0_43] : memref<72x8xf32, #tpu.memory_space<vmem>>, vector<72x8xf32>
    %cst = arith.constant dense<0.000000e+00> : vector<128x8xf32>
    %58 = tpu.matmul %56, %57, %cst {dimension_numbers = #tpu.dot_dimension_numbers<[1], [0], [0], [1], [0, 0, 1, 1], [], []>} : vector<128x72xf32>, vector<72x8xf32>, vector<128x8xf32> -> vector<128x8xf32>
    %c0_44 = arith.constant 0 : index
    %c0_45 = arith.constant 0 : index
    %c0_46 = arith.constant 0 : index
    %59 = vector.load %arg4[%c0_44, %c0_45, %c0_46] : memref<1x128x8xf32, #tpu.memory_space<vmem>>, vector<1x128x8xf32>
    %60 = vector.shape_cast %59 : vector<1x128x8xf32> to vector<128x8xf32>
    %61 = vector.shape_cast %58 : vector<128x8xf32> to vector<1x128x8xf32>
    tpu.vector_store %arg4[%c0_44, %c0_45, %c0_46], %61 {strides = array<i32>} : memref<1x128x8xf32, #tpu.memory_space<vmem>>, vector<1x128x8xf32>,
    return
  }
  func.func @transform_0(%arg0: i32, %arg1: i32) -> (i32, i32, i32, i32) {
    %c0_i32 = arith.constant 0 : i32
    %c0_i32_0 = arith.constant 0 : i32
    %c0_i32_1 = arith.constant 0 : i32
    %c0_i32_2 = arith.constant 0 : i32
    return %arg0, %c0_i32, %c0_i32_0, %c0_i32_1 : i32, i32, i32, i32
  }
  func.func @transform_1(%arg0: i32, %arg1: i32) -> (i32, i32) {
    %c0_i32 = arith.constant 0 : i32
    %c0_i32_0 = arith.constant 0 : i32
    %c0_i32_1 = arith.constant 0 : i32
    return %c0_i32, %c0_i32_0 : i32, i32
  }
  func.func @transform_2(%arg0: i32, %arg1: i32) -> (i32, i32, i32) {
    %c0_i32 = arith.constant 0 : i32
    %c0_i32_0 = arith.constant 0 : i32
    return %arg0, %arg1, %c0_i32 : i32, i32, i32
  }
}

</mosaic_0001>

<bundles_post_ra>
// kernel: tpu_custom_call.1
= control target key start
LH: loop header
LB: loop body
LE: loop exit
PB: predicated region body
PF: predicated region fallthrough
CT: control target
= control target key end

     0   :  { %s1640_s9 = smov 0   ;;  %s1642_s10 = smov 0   ;;  %s2210_s0 = inlined_call_operand.vmem [shape: f32[2,18,18,8], index: 0, kind: input, shape index: {}]   ;;  %s2211_s1 = inlined_call_operand.vmem [shape: f32[72,8], index: 1, kind: input, shape index: {}]   ;;  %s2212_s2 = inlined_call_operand.vmem [shape: f32[2,256,8], index: 2, kind: output, shape index: {}]  }
   0x1   :  { %s1644_s11 = smov 0   ;;  %s1646_s12 = smov 0  }
   0x2   :  { %s1648_s13 = smov 0  }
   0x3 LB: > { %s21_s14 = sadd.s32 1, %s1607_s11  ;;  %s24_s15 = sadd.s32 1, %s1611_s12  ;;  %s1615_s13 = sphi %s1648_s13, %s12_s13   ;;  %s1611_s12 = sphi %s1646_s12, %s2216_s12   ;;  %s1607_s11 = sphi %s1644_s11, %s2215_s11   ;;  %s1603_s10 = sphi %s1642_s10, %s2214_s10   ;;  %s1599_s9 = sphi %s1640_s9, %s2213_s9  }
   0x4   : > { %p22_p0 = scmp.ge.s32.totalorder %s21_s14, 2  ;;  %p1318_p1 = scmp.ge.s32.totalorder %s1615_s13, 1 }
   0x5   : > { %p126_p2 = scmp.lt.s32.totalorder %s1615_s13, 5 }
   0x6   : > { %s2218_s14 = smov (%p22_p0, %s21_s14), 0  ;;  %s2220_s15 = smov (!%p22_p0, %s24_s15), %s1611_s12 }
   0x7   : > { %p127_p3 = pnand %p1318_p1, %p126_p2  ;;  %p26_p4 = scmp.ge.s32.totalorder %s2220_s15, 2 }
   0x8   : > { %p152_p5 = scmp.lt.s32.totalorder (!%p127_p3), %s1603_s10, 1  ;;  %s1324_s16 = smul.u32 (!%p127_p3), 192, %s1599_s9 }
   0x9   : > { %s2222_s15 = smov (%p26_p4, %s2220_s15), 0  ;;  %130 = sbr.rel (%p127_p3) target bundleno = 592 (0x250), region = 28 }
   0xa   : > { %s1617_s22 = smov (!%p127_p3), 8   ;;  %s1618_s23 = smov (!%p127_p3), 16  }
   0xb   : > { %s1619_s24 = smov (!%p127_p3), 24   ;;  %s1620_s25 = smov (!%p127_p3), 32  }
   0xc   : > { %s1621_s26 = smov (!%p127_p3), 40   ;;  %s1622_s27 = smov (!%p127_p3), 48  }
   0xd   : > { %s1623_s28 = smov (!%p127_p3), 56  }
   0xe   : > { %s2224_s10 = smov (!%p152_p5, %s1603_s10), 1  ;;  %vm186_vm0 = vcmask 64512   ;;  %v1009_v34 = vld [vmem:[%s2211_s1 + $0x40] sm:$0xff]  ;;  %v1008_v37 = vld [vmem:[%s2211_s1 + $0x38] sm:$0xff]  ;;  %v1007_v38 = vld [vmem:[%s2211_s1 + $0x30] sm:$0xff]  ;;  %vm283_vm1 = vcmask 130112  }
   0xf   : > { %s1528_s17 = smul.u32 432, %s2224_s10  ;;  %1468 = vmatprep.subr.mxu0 %v1009_v34  ;;  %1510 = vmatprep.subr.mxu1 %v1009_v34  ;;  %v1006_v41 = vld [vmem:[%s2211_s1 + $0x28] sm:$0xff]  ;;  %v1005_v42 = vld [vmem:[%s2211_s1 + $0x20] sm:$0xff]  ;;  %v1004_v43 = vld [vmem:[%s2211_s1 + $0x18] sm:$0xff]  ;;  %vm380_vm2 = vcmask 195712   ;;  %vm480_vm3 = vcmask 261312  }
  0x10   : > { %1469 = vmatpush3.msra.mxu0 %v1009_v34  ;;  %1519 = vmatpush3.msra.mxu1 %v1009_v34  ;;  %v1003_v44 = vld [vmem:[%s2211_s1 + $0x10] sm:$0xff]  ;;  %v1002_v45 = vld [vmem:[%s2211_s1 + $0x8] sm:$0xff]  ;;  %v1001_v46 = vld [vmem:[%s2211_s1] sm:$0xff]  ;;  %vm577_vm4 = vcmask 326912   ;;  %vm674_vm5 = vcmask 392512   ;;  %vm774_vm6 = vcmask 458112  }
  0x11   : > { %s156_s20 = scalar_lea.vmem %s2210_s0, %s1528_s17  ;;  %1470 = vmatprep.subr.mxu0 %v1008_v37  ;;  %1511 = vmatprep.subr.mxu1 %v1008_v37  ;;  %vm871_vm7 = vcmask 523712   ;;  %vm968_vm8 = vcmask 589312   ;;  %vm1010_vm9 = vcmask 588800  }
  0x12   : > { %s1679_s21 = scalar_lea.vmem %s156_s20, %s1324_s16  ;;  %1471 = vmatpush3.msra.mxu0 %v1008_v37  ;;  %1520 = vmatpush3.msra.mxu1 %v1008_v37  ;;  %s1624_s16 = smov 64  }
  0x13   : > { %v204_v0 = vld [vmem:[%s1679_s21 + $0x9] sm:$0xff]  ;;  %v203_v1 = vld [vmem:[%s1679_s21 + $0x1] sm:$0xff]  ;;  %v1692_v4 = vld [vmem:[%s1679_s21 + $0x78] sm:$0xff]  ;;  %1472 = vmatprep.subr.mxu0 %v1007_v38  ;;  %1512 = vmatprep.subr.mxu1 %v1007_v38 }
  0x14   : > { %237 = vrot.lane.b32.xlu1 %v204_v0, %s1617_s22  ;;  %235 = vrot.lane.b32.xlu0 %v203_v1, %s1617_s22  ;;  %v1686_v2 = vld [vmem:[%s1679_s21 + $0x69] sm:$0xff]  ;;  %v1689_v3 = vld [vmem:[%s1679_s21 + $0x61] sm:$0xff]  ;;  %197 = vst.msk [vmem:[#allocation2 + $0x50] sm:$0xff] %vm186_vm0, %v1692_v4 }
  0x15   : > { %v1327_v5 = vld [vmem:[%s1679_s21 + $0x18] sm:$0xff]  ;;  %v1696_v6 = vld [vmem:[%s1679_s21 + $0x80] sm:$0xff]  ;;  %v1714_v10 = vld [vmem:[%s1679_s21 + $0x90] sm:$0xff]  ;;  %1473 = vmatpush3.msra.mxu0 %v1007_v38  ;;  %1521 = vmatpush3.msra.mxu1 %v1007_v38 }
  0x16   : > { %v1328_v7 = vld [vmem:[%s1679_s21 + $0x20] sm:$0xff]  ;;  %189 = vst.msk [vmem:[#allocation2 + $0x10] sm:$0xff] %vm186_vm0, %v1327_v5  ;;  %198 = vst.msk [vmem:[#allocation2 + $0x58] sm:$0xff] %vm186_vm0, %v1696_v6  ;;  %v1717_v11 = vld [vmem:[%s1679_s21 + $0x30] sm:$0xff]  ;;  %1474 = vmatprep.subr.mxu0 %v1006_v41  ;;  %1513 = vmatprep.subr.mxu1 %v1006_v41 }
  0x17   : > { %190 = vst.msk [vmem:[#allocation2 + $0x18] sm:$0xff] %vm186_vm0, %v1328_v7  ;;  %v1710_v8 = vld [vmem:[%s1679_s21 + $0x62] sm:$0xff]  ;;  %v1720_v12 = vld [vmem:[%s1679_s21 + $0x98] sm:$0xff]  ;;  %199 = vst.msk [vmem:[#allocation2 + $0x60] sm:$0xff] %vm186_vm0, %v1714_v10  ;;  %1475 = vmatpush3.msra.mxu0 %v1006_v41  ;;  %1522 = vmatpush3.msra.mxu1 %v1006_v41 }
  0x18   : > { %253 = vrot.lane.b32.xlu1 %v1686_v2, %s1617_s22  ;;  %251 = vrot.lane.b32.xlu0 %v1689_v3, %s1617_s22  ;;  %v300_v9 = vld [vmem:[%s1679_s21 + $0x2] sm:$0xff]  ;;  %v1723_v13 = vld [vmem:[%s1679_s21 + $0x38] sm:$0xff]  ;;  %191 = vst.msk [vmem:[#allocation2 + $0x20] sm:$0xff] %vm186_vm0, %v1717_v11  ;;  %200 = vst.msk [vmem:[#allocation2 + $0x68] sm:$0xff] %vm186_vm0, %v1720_v12 }
  0x19   : > { %192 = vst.msk [vmem:[#allocation2 + $0x28] sm:$0xff] %vm186_vm0, %v1723_v13  ;;  %v1737_v14 = vld [vmem:[%s1679_s21 + $0x6a] sm:$0xff]  ;;  %v170_v17 = vld [vmem:[%s1679_s21] sm:$0xff]  ;;  %v1417_v39 = vld [vmem:[%s1679_s21 + $0x92] sm:$0xff]  ;;  %1476 = vmatprep.subr.mxu0 %v1005_v42  ;;  %1514 = vmatprep.subr.mxu1 %v1005_v42 }
  0x1a   : > { %v301_v15 = vld [vmem:[%s1679_s21 + $0xa] sm:$0xff]  ;;  %187 = vst.msk [vmem:[#allocation2] sm:$0xff] %vm186_vm0, %v170_v17  ;;  %v1757_v21 = vld [vmem:[%s1679_s21 + $0x60] sm:$0xff]  ;;  %v1409_v40 = vld [vmem:[%s1679_s21 + $0x32] sm:$0xff]  ;;  %1477 = vmatpush3.msra.mxu0 %v1005_v42  ;;  %1523 = vmatpush3.msra.mxu1 %v1005_v42 }
  0x1b   : > { %v171_v16 = vld [vmem:[%s1679_s21 + $0x8] sm:$0xff]  ;;  %195 = vst.msk [vmem:[#allocation2 + $0x40] sm:$0xff] %vm186_vm0, %v1757_v21  ;;  %v1768_v22 = vld [vmem:[%s1679_s21 + $0xb0] sm:$0xff]  ;;  %v1784_v24 = vld [vmem:[%s1679_s21 + $0x79] sm:$0xff]  ;;  %1478 = vmatprep.subr.mxu0 %v1004_v43  ;;  %1515 = vmatprep.subr.mxu1 %v1004_v43 }
  0x1c   : > { %348 = vrot.lane.b32.xlu1 %v1710_v8, %s1618_s23  ;;  %332 = vrot.lane.b32.xlu0 %v300_v9, %s1618_s23  ;;  %188 = vst.msk [vmem:[#allocation2 + $0x8] sm:$0xff] %vm186_vm0, %v171_v16  ;;  %v1744_v18 = vld [vmem:[%s1679_s21 + $0xa8] sm:$0xff]  ;;  %v1771_v23 = vld [vmem:[%s1679_s21 + $0x50] sm:$0xff]  ;;  %202 = vst.msk [vmem:[#allocation2 + $0x78] sm:$0xff] %vm186_vm0, %v1768_v22 }
  0x1d   : > { %v1747_v19 = vld [vmem:[%s1679_s21 + $0x48] sm:$0xff]  ;;  %201 = vst.msk [vmem:[#allocation2 + $0x70] sm:$0xff] %vm186_vm0, %v1744_v18  ;;  %194 = vst.msk [vmem:[#allocation2 + $0x38] sm:$0xff] %vm186_vm0, %v1771_v23  ;;  %v1343_v25 = vld [vmem:[%s1679_s21 + $0x19] sm:$0xff]  ;;  %1479 = vmatpush3.msra.mxu0 %v1004_v43  ;;  %1524 = vmatpush3.msra.mxu1 %v1004_v43 }
  0x1e   : > { %v1754_v20 = vld [vmem:[%s1679_s21 + $0x68] sm:$0xff]  ;;  %193 = vst.msk [vmem:[#allocation2 + $0x30] sm:$0xff] %vm186_vm0, %v1747_v19  ;;  %v1801_v28 = vld [vmem:[%s1679_s21 + $0x7a] sm:$0xff]  ;;  %v1401_v32 = vld [vmem:[%s1679_s21 + $0x91] sm:$0xff]  ;;  %1480 = vmatprep.subr.mxu0 %v1003_v44  ;;  %1516 = vmatprep.subr.mxu1 %v1003_v44 }
  0x1f   : > { %196 = vst.msk [vmem:[#allocation2 + $0x48] sm:$0xff] %vm186_vm0, %v1754_v20  ;;  %v1794_v26 = vld [vmem:[%s1679_s21 + $0x81] sm:$0xff]  ;;  %v1393_v33 = vld [vmem:[%s1679_s21 + $0x31] sm:$0xff]  ;;  %v1402_v35 = vld [vmem:[%s1679_s21 + $0x99] sm:$0xff]  ;;  %1481 = vmatpush3.msra.mxu0 %v1003_v44  ;;  %1525 = vmatpush3.msra.mxu1 %v1003_v44 }
  0x20   : > { %350 = vrot.lane.b32.xlu1 %v1737_v14, %s1618_s23  ;;  %334 = vrot.lane.b32.xlu0 %v301_v15, %s1618_s23  ;;  %v1344_v27 = vld [vmem:[%s1679_s21 + $0x21] sm:$0xff]  ;;  %v1394_v36 = vld [vmem:[%s1679_s21 + $0x39] sm:$0xff] }
  0x21   : > { %v1359_v29 = vld [vmem:[%s1679_s21 + $0x1a] sm:$0xff]  ;;  %v1814_v30 = vld [vmem:[%s1679_s21 + $0x82] sm:$0xff]  ;;  %1482 = vmatprep.subr.mxu0 %v1002_v45  ;;  %1517 = vmatprep.subr.mxu1 %v1002_v45  ;;  %v1404_v1 = vld [vmem:[%s1679_s21 + $0xb1] sm:$0xff] }
  0x22   : > { %v1360_v31 = vld [vmem:[%s1679_s21 + $0x22] sm:$0xff]  ;;  %v1418_v47 = vld [vmem:[%s1679_s21 + $0x9a] sm:$0xff]  ;;  %1483 = vmatpush3.msra.mxu0 %v1002_v45  ;;  %1526 = vmatpush3.msra.mxu1 %v1002_v45 }
  0x23   : > { %v1410_v48 = vld [vmem:[%s1679_s21 + $0x3a] sm:$0xff]  ;;  %1484 = vmatprep.subr.mxu0 %v1001_v46  ;;  %1518 = vmatprep.subr.mxu1 %v1001_v46  ;;  %v1403_v57 = vld [vmem:[%s1679_s21 + $0xa9] sm:$0xff] }
  0x24   : > { %448 = vrot.lane.b32.xlu1 %v1692_v4, %s1619_s24  ;;  %432 = vrot.lane.b32.xlu0 %v1327_v5, %s1619_s24  ;;  %v1395_v58 = vld [vmem:[%s1679_s21 + $0x49] sm:$0xff]  ;;  %v1396_v5 = vld [vmem:[%s1679_s21 + $0x51] sm:$0xff] }
  0x25   : > { %1485 = vmatpush3.msra.mxu0 %v1001_v46  ;;  %1527 = vmatpush3.msra.mxu1 %v1001_v46  ;;  %v1389_v37 = vld [vmem:[%s1679_s21 + $0xc0] sm:$0xff]  ;;  %v1390_v44 = vld [vmem:[%s1679_s21 + $0xc8] sm:$0xff] }
  0x28   : > { %450 = vrot.lane.b32.xlu1 %v1696_v6, %s1619_s24  ;;  %434 = vrot.lane.b32.xlu0 %v1328_v7, %s1619_s24 }
  0x2c   : > { %545 = vrot.lane.b32.xlu1 %v1784_v24, %s1620_s25  ;;  %529 = vrot.lane.b32.xlu0 %v1343_v25, %s1620_s25 }
  0x30   : > { %255 = vrot.lane.b32.xlu1 %v1784_v24, %s1617_s22  ;;  %239 = vrot.lane.b32.xlu0 %v1343_v25, %s1617_s22  ;;  %v1412_v25 = vld [vmem:[%s1679_s21 + $0x52] sm:$0xff] }
  0x34   : > { %547 = vrot.lane.b32.xlu1 %v1794_v26, %s1620_s25  ;;  %531 = vrot.lane.b32.xlu0 %v1344_v27, %s1620_s25 }
  0x38   : > { %642 = vrot.lane.b32.xlu1 %v1801_v28, %s1621_s26  ;;  %626 = vrot.lane.b32.xlu0 %v1359_v29, %s1621_s26 }
  0x3c   : > { %257 = vrot.lane.b32.xlu1 %v1794_v26, %s1617_s22  ;;  %241 = vrot.lane.b32.xlu0 %v1344_v27, %s1617_s22 }
  0x40   : > { %352 = vrot.lane.b32.xlu1 %v1801_v28, %s1618_s23  ;;  %336 = vrot.lane.b32.xlu0 %v1359_v29, %s1618_s23 }
  0x44   : > { %644 = vrot.lane.b32.xlu1 %v1814_v30, %s1621_s26  ;;  %628 = vrot.lane.b32.xlu0 %v1360_v31, %s1621_s26 }
  0x48   : > { %742 = vrot.lane.b32.xlu1 %v1714_v10, %s1622_s27  ;;  %726 = vrot.lane.b32.xlu0 %v1717_v11, %s1622_s27 }
  0x4c   : > { %354 = vrot.lane.b32.xlu1 %v1814_v30, %s1618_s23  ;;  %338 = vrot.lane.b32.xlu0 %v1360_v31, %s1618_s23 }
  0x50   : > { %452 = vrot.lane.b32.xlu1 %v1714_v10, %s1619_s24  ;;  %436 = vrot.lane.b32.xlu0 %v1717_v11, %s1619_s24  ;;  %v1419_v10 = vld [vmem:[%s1679_s21 + $0xaa] sm:$0xff] }
  0x51   : > { %v1411_v11 = vld [vmem:[%s1679_s21 + $0x4a] sm:$0xff] }
  0x54   : > { %744 = vrot.lane.b32.xlu1 %v1720_v12, %s1622_s27  ;;  %728 = vrot.lane.b32.xlu0 %v1723_v13, %s1622_s27 }
  0x58   : > { %839 = vrot.lane.b32.xlu1 %v1401_v32, %s1623_s28  ;;  %823 = vrot.lane.b32.xlu0 %v1393_v33, %s1623_s28 }
  0x5c   : > { %454 = vrot.lane.b32.xlu1 %v1720_v12, %s1619_s24  ;;  %438 = vrot.lane.b32.xlu0 %v1723_v13, %s1619_s24 }
  0x60   : > { %549 = vrot.lane.b32.xlu1 %v1401_v32, %s1620_s25  ;;  %533 = vrot.lane.b32.xlu0 %v1393_v33, %s1620_s25 }
  0x64   : > { %841 = vrot.lane.b32.xlu1 %v1402_v35, %s1623_s28  ;;  %825 = vrot.lane.b32.xlu0 %v1394_v36, %s1623_s28 }
  0x68   : > { %936 = vrot.lane.b32.xlu1 %v1417_v39, %s1624_s16  ;;  %920 = vrot.lane.b32.xlu0 %v1409_v40, %s1624_s16 }
  0x6c   : > { %259 = vrot.lane.b32.xlu1 %v1401_v32, %s1617_s22  ;;  %243 = vrot.lane.b32.xlu0 %v1393_v33, %s1617_s22 }
  0x70   : > { %551 = vrot.lane.b32.xlu1 %v1402_v35, %s1620_s25  ;;  %535 = vrot.lane.b32.xlu0 %v1394_v36, %s1620_s25 }
  0x74   : > { %646 = vrot.lane.b32.xlu1 %v1417_v39, %s1621_s26  ;;  %630 = vrot.lane.b32.xlu0 %v1409_v40, %s1621_s26 }
  0x78   : > { %938 = vrot.lane.b32.xlu1 %v1418_v47, %s1624_s16  ;;  %922 = vrot.lane.b32.xlu0 %v1410_v48, %s1624_s16 }
  0x7c   : > { %261 = vrot.lane.b32.xlu1 %v1402_v35, %s1617_s22  ;;  %245 = vrot.lane.b32.xlu0 %v1394_v36, %s1617_s22 }
  0x80   : > { %356 = vrot.lane.b32.xlu1 %v1417_v39, %s1618_s23  ;;  %340 = vrot.lane.b32.xlu0 %v1409_v40, %s1618_s23 }
  0x84   : > { %648 = vrot.lane.b32.xlu1 %v1418_v47, %s1621_s26  ;;  %632 = vrot.lane.b32.xlu0 %v1410_v48, %s1621_s26 }
  0x86   : > { %v238_v49 = vpop.permute.xlu1 %237  ;;  %v236_v50 = vpop.permute.xlu0 %235 }
  0x87   : > { %285 = vst.msk [vmem:[#allocation2 + $0x8] sm:$0xff] %vm283_vm1, %v238_v49  ;;  %284 = vst.msk [vmem:[#allocation2] sm:$0xff] %vm283_vm1, %v236_v50 }
  0x88   : > { %746 = vrot.lane.b32.xlu1 %v1744_v18, %s1622_s27  ;;  %730 = vrot.lane.b32.xlu0 %v1747_v19, %s1622_s27 }
  0x8a   : > { %v254_v51 = vpop.permute.xlu1 %253  ;;  %v252_v52 = vpop.permute.xlu0 %251 }
  0x8b   : > { %293 = vst.msk [vmem:[#allocation2 + $0x48] sm:$0xff] %vm283_vm1, %v254_v51  ;;  %292 = vst.msk [vmem:[#allocation2 + $0x40] sm:$0xff] %vm283_vm1, %v252_v52 }
  0x8c   : > { %358 = vrot.lane.b32.xlu1 %v1418_v47, %s1618_s23  ;;  %342 = vrot.lane.b32.xlu0 %v1410_v48, %s1618_s23  ;;  %v1405_v47 = vld [vmem:[%s1679_s21 + $0xc1] sm:$0xff] }
  0x8e   : > { %v349_v53 = vpop.permute.xlu1 %348  ;;  %v333_v54 = vpop.permute.xlu0 %332 }
  0x8f   : > { %389 = vst.msk [vmem:[#allocation2 + $0x40] sm:$0xff] %vm380_vm2, %v349_v53  ;;  %381 = vst.msk [vmem:[#allocation2] sm:$0xff] %vm380_vm2, %v333_v54  ;;  %v1406_v53 = vld [vmem:[%s1679_s21 + $0xc9] sm:$0xff] }
  0x90   : > { %456 = vrot.lane.b32.xlu1 %v1744_v18, %s1619_s24  ;;  %440 = vrot.lane.b32.xlu0 %v1747_v19, %s1619_s24 }
  0x92   : > { %v351_v55 = vpop.permute.xlu1 %350  ;;  %v335_v56 = vpop.permute.xlu0 %334 }
  0x93   : > { %390 = vst.msk [vmem:[#allocation2 + $0x48] sm:$0xff] %vm380_vm2, %v351_v55  ;;  %382 = vst.msk [vmem:[#allocation2 + $0x8] sm:$0xff] %vm380_vm2, %v335_v56 }
  0x94   : > { %748 = vrot.lane.b32.xlu1 %v1768_v22, %s1622_s27  ;;  %732 = vrot.lane.b32.xlu0 %v1771_v23, %s1622_s27 }
  0x96   : > { %v449_v59 = vpop.permute.xlu1 %448  ;;  %v433_v60 = vpop.permute.xlu0 %432 }
  0x97   : > { %489 = vst.msk [vmem:[#allocation2 + $0x40] sm:$0xff] %vm480_vm3, %v449_v59  ;;  %481 = vst.msk [vmem:[#allocation2] sm:$0xff] %vm480_vm3, %v433_v60 }
  0x98   : > { %843 = vrot.lane.b32.xlu1 %v1403_v57, %s1623_s28  ;;  %827 = vrot.lane.b32.xlu0 %v1395_v58, %s1623_s28 }
  0x9a   : > { %v451_v61 = vpop.permute.xlu1 %450  ;;  %v435_v62 = vpop.permute.xlu0 %434 }
  0x9b   : > { %490 = vst.msk [vmem:[#allocation2 + $0x48] sm:$0xff] %vm480_vm3, %v451_v61  ;;  %482 = vst.msk [vmem:[#allocation2 + $0x8] sm:$0xff] %vm480_vm3, %v435_v62 }
  0x9c   : > { %458 = vrot.lane.b32.xlu1 %v1768_v22, %s1619_s24  ;;  %442 = vrot.lane.b32.xlu0 %v1771_v23, %s1619_s24  ;;  %v1420_v23 = vld [vmem:[%s1679_s21 + $0xb2] sm:$0xff] }
  0x9e   : > { %v546_v63 = vpop.permute.xlu1 %545  ;;  %v530_v0 = vpop.permute.xlu0 %529 }
  0x9f   : > { %586 = vst.msk [vmem:[#allocation2 + $0x40] sm:$0xff] %vm577_vm4, %v546_v63  ;;  %578 = vst.msk [vmem:[#allocation2] sm:$0xff] %vm577_vm4, %v530_v0  ;;  %v1422_v63 = vld [vmem:[%s1679_s21 + $0xca] sm:$0xff] }
  0xa0   : > { %553 = vrot.lane.b32.xlu1 %v1403_v57, %s1620_s25  ;;  %537 = vrot.lane.b32.xlu0 %v1395_v58, %s1620_s25 }
  0xa2   : > { %v256_v7 = vpop.permute.xlu1 %255  ;;  %v240_v9 = vpop.permute.xlu0 %239 }
  0xa3   : > { %294 = vst.msk [vmem:[#allocation2 + $0x50] sm:$0xff] %vm283_vm1, %v256_v7  ;;  %286 = vst.msk [vmem:[#allocation2 + $0x10] sm:$0xff] %vm283_vm1, %v240_v9  ;;  %v1391_v9 = vld [vmem:[%s1679_s21 + $0xd8] sm:$0xff] }
  0xa4   : > { %845 = vrot.lane.b32.xlu1 %v1404_v1, %s1623_s28  ;;  %829 = vrot.lane.b32.xlu0 %v1396_v5, %s1623_s28 }
  0xa6   : > { %v548_v12 = vpop.permute.xlu1 %547  ;;  %v532_v13 = vpop.permute.xlu0 %531 }
  0xa7   : > { %587 = vst.msk [vmem:[#allocation2 + $0x48] sm:$0xff] %vm577_vm4, %v548_v12  ;;  %579 = vst.msk [vmem:[#allocation2 + $0x8] sm:$0xff] %vm577_vm4, %v532_v13  ;;  %v1392_v12 = vld [vmem:[%s1679_s21 + $0xe0] sm:$0xff] }
  0xa8   : > { %940 = vrot.lane.b32.xlu1 %v1419_v10, %s1624_s16  ;;  %924 = vrot.lane.b32.xlu0 %v1411_v11, %s1624_s16 }
  0xaa   : > { %v643_v15 = vpop.permute.xlu1 %642  ;;  %v627_v16 = vpop.permute.xlu0 %626 }
  0xab   : > { %683 = vst.msk [vmem:[#allocation2 + $0x40] sm:$0xff] %vm674_vm5, %v643_v15  ;;  %675 = vst.msk [vmem:[#allocation2] sm:$0xff] %vm674_vm5, %v627_v16 }
  0xac   : > { %263 = vrot.lane.b32.xlu1 %v1403_v57, %s1617_s22  ;;  %247 = vrot.lane.b32.xlu0 %v1395_v58, %s1617_s22 }
  0xae   : > { %v258_v17 = vpop.permute.xlu1 %257  ;;  %v242_v18 = vpop.permute.xlu0 %241 }
  0xaf   : > { %295 = vst.msk [vmem:[#allocation2 + $0x58] sm:$0xff] %vm283_vm1, %v258_v17  ;;  %287 = vst.msk [vmem:[#allocation2 + $0x18] sm:$0xff] %vm283_vm1, %v242_v18 }
  0xb0   : > { %555 = vrot.lane.b32.xlu1 %v1404_v1, %s1620_s25  ;;  %539 = vrot.lane.b32.xlu0 %v1396_v5, %s1620_s25 }
  0xb2   : > { %v353_v19 = vpop.permute.xlu1 %352  ;;  %v337_v22 = vpop.permute.xlu0 %336 }
  0xb3   : > { %391 = vst.msk [vmem:[#allocation2 + $0x50] sm:$0xff] %vm380_vm2, %v353_v19  ;;  %383 = vst.msk [vmem:[#allocation2 + $0x10] sm:$0xff] %vm380_vm2, %v337_v22 }
  0xb4   : > { %650 = vrot.lane.b32.xlu1 %v1419_v10, %s1621_s26  ;;  %634 = vrot.lane.b32.xlu0 %v1411_v11, %s1621_s26 }
  0xb6   : > { %v645_v27 = vpop.permute.xlu1 %644  ;;  %v629_v29 = vpop.permute.xlu0 %628 }
  0xb7   : > { %684 = vst.msk [vmem:[#allocation2 + $0x48] sm:$0xff] %vm674_vm5, %v645_v27  ;;  %676 = vst.msk [vmem:[#allocation2 + $0x8] sm:$0xff] %vm674_vm5, %v629_v29 }
  0xb8   : > { %942 = vrot.lane.b32.xlu1 %v1420_v23, %s1624_s16  ;;  %926 = vrot.lane.b32.xlu0 %v1412_v25, %s1624_s16 }
  0xba   : > { %v743_v31 = vpop.permute.xlu1 %742  ;;  %v727_v32 = vpop.permute.xlu0 %726 }
  0xbb   : > { %783 = vst.msk [vmem:[#allocation2 + $0x40] sm:$0xff] %vm774_vm6, %v743_v31  ;;  %775 = vst.msk [vmem:[#allocation2] sm:$0xff] %vm774_vm6, %v727_v32 }
  0xbc   : > { %265 = vrot.lane.b32.xlu1 %v1404_v1, %s1617_s22  ;;  %249 = vrot.lane.b32.xlu0 %v1396_v5, %s1617_s22  ;;  %s1321_s22 = sshll.u32 %s2224_s10, 5 }
  0xbe   : > { %v355_v33 = vpop.permute.xlu1 %354  ;;  %v339_v34 = vpop.permute.xlu0 %338 }
  0xbf   : > { %392 = vst.msk [vmem:[#allocation2 + $0x58] sm:$0xff] %vm380_vm2, %v355_v33  ;;  %384 = vst.msk [vmem:[#allocation2 + $0x18] sm:$0xff] %vm380_vm2, %v339_v34 }
  0xc0   : > { %360 = vrot.lane.b32.xlu1 %v1419_v10, %s1618_s23  ;;  %344 = vrot.lane.b32.xlu0 %v1411_v11, %s1618_s23 }
  0xc2   : > { %v453_v35 = vpop.permute.xlu1 %452  ;;  %v437_v36 = vpop.permute.xlu0 %436 }
  0xc3   : > { %491 = vst.msk [vmem:[#allocation2 + $0x50] sm:$0xff] %vm480_vm3, %v453_v35  ;;  %483 = vst.msk [vmem:[#allocation2 + $0x10] sm:$0xff] %vm480_vm3, %v437_v36 }
  0xc4   : > { %652 = vrot.lane.b32.xlu1 %v1420_v23, %s1621_s26  ;;  %636 = vrot.lane.b32.xlu0 %v1412_v25, %s1621_s26 }
  0xc6   : > { %v745_v38 = vpop.permute.xlu1 %744  ;;  %v729_v39 = vpop.permute.xlu0 %728 }
  0xc7   : > { %784 = vst.msk [vmem:[#allocation2 + $0x48] sm:$0xff] %vm774_vm6, %v745_v38  ;;  %776 = vst.msk [vmem:[#allocation2 + $0x8] sm:$0xff] %vm774_vm6, %v729_v39 }
  0xc8   : > { %750 = vrot.lane.b32.xlu1 %v1389_v37, %s1622_s27  ;;  %734 = vrot.lane.b32.xlu0 %v1757_v21, %s1622_s27 }
  0xca   : > { %v840_v40 = vpop.permute.xlu1 %839  ;;  %v824_v41 = vpop.permute.xlu0 %823 }
  0xcb   : > { %880 = vst.msk [vmem:[#allocation2 + $0x40] sm:$0xff] %vm871_vm7, %v840_v40  ;;  %872 = vst.msk [vmem:[#allocation2] sm:$0xff] %vm871_vm7, %v824_v41 }
  0xcc   : > { %362 = vrot.lane.b32.xlu1 %v1420_v23, %s1618_s23  ;;  %346 = vrot.lane.b32.xlu0 %v1412_v25, %s1618_s23 }
  0xce   : > { %v455_v42 = vpop.permute.xlu1 %454  ;;  %v439_v43 = vpop.permute.xlu0 %438 }
  0xcf   : > { %492 = vst.msk [vmem:[#allocation2 + $0x58] sm:$0xff] %vm480_vm3, %v455_v42  ;;  %484 = vst.msk [vmem:[#allocation2 + $0x18] sm:$0xff] %vm480_vm3, %v439_v43 }
  0xd0   : > { %460 = vrot.lane.b32.xlu1 %v1389_v37, %s1619_s24  ;;  %444 = vrot.lane.b32.xlu0 %v1757_v21, %s1619_s24 }
  0xd2   : > { %v550_v45 = vpop.permute.xlu1 %549  ;;  %v534_v46 = vpop.permute.xlu0 %533 }
  0xd3   : > { %588 = vst.msk [vmem:[#allocation2 + $0x50] sm:$0xff] %vm577_vm4, %v550_v45  ;;  %580 = vst.msk [vmem:[#allocation2 + $0x10] sm:$0xff] %vm577_vm4, %v534_v46 }
  0xd4   : > { %752 = vrot.lane.b32.xlu1 %v1390_v44, %s1622_s27  ;;  %736 = vrot.lane.b32.xlu0 %v1754_v20, %s1622_s27 }
  0xd6   : > { %v842_v48 = vpop.permute.xlu1 %841  ;;  %v826_v49 = vpop.permute.xlu0 %825 }
  0xd7   : > { %881 = vst.msk [vmem:[#allocation2 + $0x48] sm:$0xff] %vm871_vm7, %v842_v48  ;;  %873 = vst.msk [vmem:[#allocation2 + $0x8] sm:$0xff] %vm871_vm7, %v826_v49 }
  0xd8   : > { %847 = vrot.lane.b32.xlu1 %v1405_v47, %s1623_s28  ;;  %831 = vrot.lane.b32.xlu0 %v1689_v3, %s1623_s28 }
  0xda   : > { %v937_v21 = vpop.permute.xlu1 %936  ;;  %v921_v50 = vpop.permute.xlu0 %920 }
  0xdb   : > { %977 = vst.msk [vmem:[#allocation2 + $0x40] sm:$0xff] %vm968_vm8, %v937_v21  ;;  %969 = vst.msk [vmem:[#allocation2] sm:$0xff] %vm968_vm8, %v921_v50 }
  0xdc   : > { %462 = vrot.lane.b32.xlu1 %v1390_v44, %s1619_s24  ;;  %446 = vrot.lane.b32.xlu0 %v1754_v20, %s1619_s24 }
  0xde   : > { %v260_v51 = vpop.permute.xlu1 %259  ;;  %v244_v52 = vpop.permute.xlu0 %243 }
  0xdf   : > { %296 = vst.msk [vmem:[#allocation2 + $0x60] sm:$0xff] %vm283_vm1, %v260_v51  ;;  %288 = vst.msk [vmem:[#allocation2 + $0x20] sm:$0xff] %vm283_vm1, %v244_v52 }
  0xe0   : > { %557 = vrot.lane.b32.xlu1 %v1405_v47, %s1620_s25  ;;  %541 = vrot.lane.b32.xlu0 %v1689_v3, %s1620_s25  ;;  %v1421_v3 = vld [vmem:[%s1679_s21 + $0xc2] sm:$0xff] }
  0xe2   : > { %v552_v54 = vpop.permute.xlu1 %551  ;;  %v536_v55 = vpop.permute.xlu0 %535  ;;  %v985_v56 = vld [vmem:[#allocation2] sm:$0xff] }
  0xe3   : > { %v993_v57 = vld [vmem:[#allocation2 + $0x40] sm:$0xff]  ;;  %589 = vst.msk [vmem:[#allocation2 + $0x58] sm:$0xff] %vm577_vm4, %v552_v54  ;;  %581 = vst.msk [vmem:[#allocation2 + $0x18] sm:$0xff] %vm577_vm4, %v536_v55  ;;  %1486 = vmatprep.mubr.msk.f32.mxu0 %vm1010_vm9, %v985_v56 }
  0xe4   : > { %1498 = vmatprep.mubr.msk.f32.mxu1 %vm1010_vm9, %v993_v57  ;;  %849 = vrot.lane.b32.xlu1 %v1406_v53, %s1623_s28 }
  0xe5   : > { %833 = vrot.lane.b32.xlu0 %v1686_v2, %s1623_s28 }
  0xe6   : > { %v647_v20 = vpop.permute.xlu1 %646  ;;  %v631_v58 = vpop.permute.xlu0 %630 }
  0xe7   : > { %685 = vst.msk [vmem:[#allocation2 + $0x50] sm:$0xff] %vm674_vm5, %v647_v20  ;;  %677 = vst.msk [vmem:[#allocation2 + $0x10] sm:$0xff] %vm674_vm5, %v631_v58 }
  0xe8   : > { %944 = vrot.lane.b32.xlu1 %v1421_v3, %s1624_s16 }
  0xe9   : > { %928 = vrot.lane.b32.xlu0 %v1710_v8, %s1624_s16 }
  0xea   : > { %v939_v59 = vpop.permute.xlu1 %938  ;;  %v923_v60 = vpop.permute.xlu0 %922 }
  0xeb   : > { %978 = vst.msk [vmem:[#allocation2 + $0x48] sm:$0xff] %vm968_vm8, %v939_v59  ;;  %970 = vst.msk [vmem:[#allocation2 + $0x8] sm:$0xff] %vm968_vm8, %v923_v60 }
  0xec   : > { %559 = vrot.lane.b32.xlu1 %v1406_v53, %s1620_s25 }
  0xed   : > { %543 = vrot.lane.b32.xlu0 %v1686_v2, %s1620_s25 }
  0xee   : > { %v262_v61 = vpop.permute.xlu1 %261  ;;  %v246_v62 = vpop.permute.xlu0 %245 }
  0xef   : > { %297 = vst.msk [vmem:[#allocation2 + $0x68] sm:$0xff] %vm283_vm1, %v262_v61  ;;  %289 = vst.msk [vmem:[#allocation2 + $0x28] sm:$0xff] %vm283_vm1, %v246_v62 }
  0xf0   : > { %654 = vrot.lane.b32.xlu1 %v1421_v3, %s1621_s26 }
  0xf1   : > { %638 = vrot.lane.b32.xlu0 %v1710_v8, %s1621_s26 }
  0xf2   : > { %v357_v0 = vpop.permute.xlu1 %356  ;;  %v341_v1 = vpop.permute.xlu0 %340  ;;  %v986_v5 = vld [vmem:[#allocation2 + $0x8] sm:$0xff] }
  0xf3   : > { %v994_v7 = vld [vmem:[#allocation2 + $0x48] sm:$0xff]  ;;  %393 = vst.msk [vmem:[#allocation2 + $0x60] sm:$0xff] %vm380_vm2, %v357_v0  ;;  %385 = vst.msk [vmem:[#allocation2 + $0x20] sm:$0xff] %vm380_vm2, %v341_v1  ;;  %1487 = vmatmul.mubr.msk.f32.vlgmr.msra.gmra.mxu0 %vm1010_vm9, %v986_v5 }
  0xf4   : > { %1499 = vmatmul.mubr.msk.f32.vlgmr.msra.gmra.mxu1 %vm1010_vm9, %v994_v7  ;;  %946 = vrot.lane.b32.xlu1 %v1422_v63, %s1624_s16 }
  0xf5   : > { %930 = vrot.lane.b32.xlu0 %v1737_v14, %s1624_s16 }
  0xf6   : > { %v649_v2 = vpop.permute.xlu1 %648  ;;  %v633_v8 = vpop.permute.xlu0 %632 }
  0xf7   : > { %686 = vst.msk [vmem:[#allocation2 + $0x58] sm:$0xff] %vm674_vm5, %v649_v2  ;;  %678 = vst.msk [vmem:[#allocation2 + $0x18] sm:$0xff] %vm674_vm5, %v633_v8 }
  0xf8   : > { %656 = vrot.lane.b32.xlu1 %v1422_v63, %s1621_s26 }
  0xf9   : > { %640 = vrot.lane.b32.xlu0 %v1737_v14, %s1621_s26  ;;  %v1407_v14 = vld [vmem:[%s1679_s21 + $0xd9] sm:$0xff] }
  0xfa   : > { %v747_v10 = vpop.permute.xlu1 %746  ;;  %v731_v11 = vpop.permute.xlu0 %730 }
  0xfb   : > { %785 = vst.msk [vmem:[#allocation2 + $0x50] sm:$0xff] %vm774_vm6, %v747_v10  ;;  %777 = vst.msk [vmem:[#allocation2 + $0x10] sm:$0xff] %vm774_vm6, %v731_v11 }
  0xfc   : > { %754 = vrot.lane.b32.xlu1 %v1391_v9, %s1622_s27 }
  0xfd   : > { %738 = vrot.lane.b32.xlu0 %v1692_v4, %s1622_s27  ;;  %v1408_v4 = vld [vmem:[%s1679_s21 + $0xe1] sm:$0xff] }
  0xfe   : > { %v359_v13 = vpop.permute.xlu1 %358  ;;  %v343_v15 = vpop.permute.xlu0 %342 }
  0xff   : > { %394 = vst.msk [vmem:[#allocation2 + $0x68] sm:$0xff] %vm380_vm2, %v359_v13  ;;  %386 = vst.msk [vmem:[#allocation2 + $0x28] sm:$0xff] %vm380_vm2, %v343_v15 }
 0x100   : > { %756 = vrot.lane.b32.xlu1 %v1392_v12, %s1622_s27 }
 0x101   : > { %740 = vrot.lane.b32.xlu0 %v1696_v6, %s1622_s27  ;;  %v1423_v6 = vld [vmem:[%s1679_s21 + $0xda] sm:$0xff] }
 0x102   : > { %v457_v16 = vpop.permute.xlu1 %456  ;;  %v441_v17 = vpop.permute.xlu0 %440 }
 0x103   : > { %493 = vst.msk [vmem:[#allocation2 + $0x60] sm:$0xff] %vm480_vm3, %v457_v16  ;;  %485 = vst.msk [vmem:[#allocation2 + $0x20] sm:$0xff] %vm480_vm3, %v441_v17 }
 0x104   : > { %851 = vrot.lane.b32.xlu1 %v1407_v14, %s1623_s28 }
 0x105   : > { %835 = vrot.lane.b32.xlu0 %v1784_v24, %s1623_s28  ;;  %v1424_v24 = vld [vmem:[%s1679_s21 + $0xe2] sm:$0xff]  ;;  %s1320_s21 = sshll.u32 %s1599_s9, 4 }
 0x106   : > { %v749_v18 = vpop.permute.xlu1 %748  ;;  %v733_v19 = vpop.permute.xlu0 %732  ;;  %p160_p6 = scmp.lt.s32.totalorder %s1320_s21, 31 }
 0x107   : > { %786 = vst.msk [vmem:[#allocation2 + $0x58] sm:$0xff] %vm774_vm6, %v749_v18  ;;  %778 = vst.msk [vmem:[#allocation2 + $0x18] sm:$0xff] %vm774_vm6, %v733_v19 }
 0x108   : > { %853 = vrot.lane.b32.xlu1 %v1408_v4, %s1623_s28  ;;  %s2226_s21 = smov (!%p160_p6, %s1320_s21), 31 }
 0x109   : > { %837 = vrot.lane.b32.xlu0 %v1794_v26, %s1623_s28  ;;  %s163_s23 = sadd.s32 %s1321_s22, %s2226_s21 }
 0x10a   : > { %v844_v22 = vpop.permute.xlu1 %843  ;;  %v828_v23 = vpop.permute.xlu0 %827  ;;  %s1322_s24 = sshll.u32 %s163_s23, 3 }
 0x10b   : > { %882 = vst.msk [vmem:[#allocation2 + $0x50] sm:$0xff] %vm871_vm7, %v844_v22  ;;  %874 = vst.msk [vmem:[#allocation2 + $0x10] sm:$0xff] %vm871_vm7, %v828_v23  ;;  %s2161_s27 = scalar_lea.vmem %s2212_s2, %s1322_s24 }
 0x10c   : > { %948 = vrot.lane.b32.xlu1 %v1423_v6, %s1624_s16 }
 0x10d   : > { %932 = vrot.lane.b32.xlu0 %v1801_v28, %s1624_s16 }
 0x10e   : > { %v459_v25 = vpop.permute.xlu1 %458  ;;  %v443_v27 = vpop.permute.xlu0 %442 }
 0x10f   : > { %494 = vst.msk [vmem:[#allocation2 + $0x68] sm:$0xff] %vm480_vm3, %v459_v25  ;;  %486 = vst.msk [vmem:[#allocation2 + $0x28] sm:$0xff] %vm480_vm3, %v443_v27 }
 0x110   : > { %950 = vrot.lane.b32.xlu1 %v1424_v24, %s1624_s16 }
 0x111   : > { %934 = vrot.lane.b32.xlu0 %v1814_v30, %s1624_s16 }
 0x112   : > { %v554_v26 = vpop.permute.xlu1 %553  ;;  %v538_v29 = vpop.permute.xlu0 %537 }
 0x113   : > { %590 = vst.msk [vmem:[#allocation2 + $0x60] sm:$0xff] %vm577_vm4, %v554_v26  ;;  %582 = vst.msk [vmem:[#allocation2 + $0x20] sm:$0xff] %vm577_vm4, %v538_v29 }
 0x116   : > { %v846_v31 = vpop.permute.xlu1 %845  ;;  %v830_v28 = vpop.permute.xlu0 %829 }
 0x117   : > { %883 = vst.msk [vmem:[#allocation2 + $0x58] sm:$0xff] %vm871_vm7, %v846_v31  ;;  %875 = vst.msk [vmem:[#allocation2 + $0x18] sm:$0xff] %vm871_vm7, %v830_v28 }
 0x11a   : > { %v941_v32 = vpop.permute.xlu1 %940  ;;  %v925_v33 = vpop.permute.xlu0 %924 }
 0x11b   : > { %979 = vst.msk [vmem:[#allocation2 + $0x50] sm:$0xff] %vm968_vm8, %v941_v32  ;;  %971 = vst.msk [vmem:[#allocation2 + $0x10] sm:$0xff] %vm968_vm8, %v925_v33 }
 0x11e   : > { %v264_v34 = vpop.permute.xlu1 %263  ;;  %v248_v30 = vpop.permute.xlu0 %247 }
 0x11f   : > { %298 = vst.msk [vmem:[#allocation2 + $0x70] sm:$0xff] %vm283_vm1, %v264_v34  ;;  %290 = vst.msk [vmem:[#allocation2 + $0x30] sm:$0xff] %vm283_vm1, %v248_v30 }
 0x122   : > { %v556_v35 = vpop.permute.xlu1 %555  ;;  %v540_v36 = vpop.permute.xlu0 %539  ;;  %v987_v37 = vld [vmem:[#allocation2 + $0x10] sm:$0xff] }
 0x123   : > { %v995_v38 = vld [vmem:[#allocation2 + $0x50] sm:$0xff]  ;;  %591 = vst.msk [vmem:[#allocation2 + $0x68] sm:$0xff] %vm577_vm4, %v556_v35  ;;  %583 = vst.msk [vmem:[#allocation2 + $0x28] sm:$0xff] %vm577_vm4, %v540_v36  ;;  %1489 = vmatprep.mubr.msk.f32.mxu0 %vm1010_vm9, %v987_v37 }
 0x124   : > { %1501 = vmatprep.mubr.msk.f32.mxu1 %vm1010_vm9, %v995_v38 }
 0x126   : > { %v651_v39 = vpop.permute.xlu1 %650  ;;  %v635_v40 = vpop.permute.xlu0 %634 }
 0x127   : > { %687 = vst.msk [vmem:[#allocation2 + $0x60] sm:$0xff] %vm674_vm5, %v651_v39  ;;  %679 = vst.msk [vmem:[#allocation2 + $0x20] sm:$0xff] %vm674_vm5, %v635_v40 }
 0x12a   : > { %v943_v41 = vpop.permute.xlu1 %942  ;;  %v927_v42 = vpop.permute.xlu0 %926 }
 0x12b   : > { %980 = vst.msk [vmem:[#allocation2 + $0x58] sm:$0xff] %vm968_vm8, %v943_v41  ;;  %972 = vst.msk [vmem:[#allocation2 + $0x18] sm:$0xff] %vm968_vm8, %v927_v42 }
 0x12e   : > { %v266_v43 = vpop.permute.xlu1 %265  ;;  %v250_v44 = vpop.permute.xlu0 %249 }
 0x12f   : > { %299 = vst.msk [vmem:[#allocation2 + $0x78] sm:$0xff] %vm283_vm1, %v266_v43  ;;  %291 = vst.msk [vmem:[#allocation2 + $0x38] sm:$0xff] %vm283_vm1, %v250_v44 }
 0x132   : > { %v361_v45 = vpop.permute.xlu1 %360  ;;  %v345_v46 = vpop.permute.xlu0 %344  ;;  %v988_v47 = vld [vmem:[#allocation2 + $0x18] sm:$0xff] }
 0x133   : > { %v996_v48 = vld [vmem:[#allocation2 + $0x58] sm:$0xff]  ;;  %395 = vst.msk [vmem:[#allocation2 + $0x70] sm:$0xff] %vm380_vm2, %v361_v45  ;;  %387 = vst.msk [vmem:[#allocation2 + $0x30] sm:$0xff] %vm380_vm2, %v345_v46  ;;  %1490 = vmatmul.mubr.msk.f32.gmra.mxu0 %vm1010_vm9, %v988_v47 }
 0x134   : > { %1502 = vmatmul.mubr.msk.f32.gmra.mxu1 %vm1010_vm9, %v996_v48 }
 0x136   : > { %v653_v49 = vpop.permute.xlu1 %652  ;;  %v637_v21 = vpop.permute.xlu0 %636 }
 0x137   : > { %688 = vst.msk [vmem:[#allocation2 + $0x68] sm:$0xff] %vm674_vm5, %v653_v49  ;;  %680 = vst.msk [vmem:[#allocation2 + $0x28] sm:$0xff] %vm674_vm5, %v637_v21 }
 0x13a   : > { %v751_v50 = vpop.permute.xlu1 %750  ;;  %v735_v51 = vpop.permute.xlu0 %734 }
 0x13b   : > { %787 = vst.msk [vmem:[#allocation2 + $0x60] sm:$0xff] %vm774_vm6, %v751_v50  ;;  %779 = vst.msk [vmem:[#allocation2 + $0x20] sm:$0xff] %vm774_vm6, %v735_v51 }
 0x13e   : > { %v363_v52 = vpop.permute.xlu1 %362  ;;  %v347_v53 = vpop.permute.xlu0 %346 }
 0x13f   : > { %396 = vst.msk [vmem:[#allocation2 + $0x78] sm:$0xff] %vm380_vm2, %v363_v52  ;;  %388 = vst.msk [vmem:[#allocation2 + $0x38] sm:$0xff] %vm380_vm2, %v347_v53 }
 0x142   : > { %v461_v54 = vpop.permute.xlu1 %460  ;;  %v445_v55 = vpop.permute.xlu0 %444 }
 0x143   : > { %495 = vst.msk [vmem:[#allocation2 + $0x70] sm:$0xff] %vm480_vm3, %v461_v54  ;;  %487 = vst.msk [vmem:[#allocation2 + $0x30] sm:$0xff] %vm480_vm3, %v445_v55 }
 0x146   : > { %v753_v56 = vpop.permute.xlu1 %752  ;;  %v737_v57 = vpop.permute.xlu0 %736 }
 0x147   : > { %788 = vst.msk [vmem:[#allocation2 + $0x68] sm:$0xff] %vm774_vm6, %v753_v56  ;;  %780 = vst.msk [vmem:[#allocation2 + $0x28] sm:$0xff] %vm774_vm6, %v737_v57 }
 0x14a   : > { %v848_v3 = vpop.permute.xlu1 %847  ;;  %v832_v20 = vpop.permute.xlu0 %831 }
 0x14b   : > { %884 = vst.msk [vmem:[#allocation2 + $0x60] sm:$0xff] %vm871_vm7, %v848_v3  ;;  %876 = vst.msk [vmem:[#allocation2 + $0x20] sm:$0xff] %vm871_vm7, %v832_v20 }
 0x14e   : > { %v463_v58 = vpop.permute.xlu1 %462  ;;  %v447_v59 = vpop.permute.xlu0 %446 }
 0x14f   : > { %496 = vst.msk [vmem:[#allocation2 + $0x78] sm:$0xff] %vm480_vm3, %v463_v58  ;;  %488 = vst.msk [vmem:[#allocation2 + $0x38] sm:$0xff] %vm480_vm3, %v447_v59 }
 0x152   : > { %v558_v60 = vpop.permute.xlu1 %557  ;;  %v542_v61 = vpop.permute.xlu0 %541 }
 0x153   : > { %592 = vst.msk [vmem:[#allocation2 + $0x70] sm:$0xff] %vm577_vm4, %v558_v60  ;;  %584 = vst.msk [vmem:[#allocation2 + $0x30] sm:$0xff] %vm577_vm4, %v542_v61 }
 0x156   : > { %v850_v62 = vpop.permute.xlu1 %849 }
 0x157   : > { %v834_v63 = vpop.permute.xlu0 %833  ;;  %885 = vst.msk [vmem:[#allocation2 + $0x68] sm:$0xff] %vm871_vm7, %v850_v62 }
 0x158   : > { %877 = vst.msk [vmem:[#allocation2 + $0x28] sm:$0xff] %vm871_vm7, %v834_v63 }
 0x15a   : > { %v945_v0 = vpop.permute.xlu1 %944 }
 0x15b   : > { %v929_v1 = vpop.permute.xlu0 %928  ;;  %981 = vst.msk [vmem:[#allocation2 + $0x60] sm:$0xff] %vm968_vm8, %v945_v0 }
 0x15c   : > { %973 = vst.msk [vmem:[#allocation2 + $0x20] sm:$0xff] %vm968_vm8, %v929_v1 }
 0x15e   : > { %v560_v5 = vpop.permute.xlu1 %559 }
 0x15f   : > { %v544_v7 = vpop.permute.xlu0 %543  ;;  %593 = vst.msk [vmem:[#allocation2 + $0x78] sm:$0xff] %vm577_vm4, %v560_v5 }
 0x160   : > { %585 = vst.msk [vmem:[#allocation2 + $0x38] sm:$0xff] %vm577_vm4, %v544_v7 }
 0x162   : > { %v655_v2 = vpop.permute.xlu1 %654  ;;  %v997_v10 = vld [vmem:[#allocation2 + $0x60] sm:$0xff] }
 0x163   : > { %v639_v8 = vpop.permute.xlu0 %638  ;;  %v989_v9 = vld [vmem:[#allocation2 + $0x20] sm:$0xff]  ;;  %689 = vst.msk [vmem:[#allocation2 + $0x70] sm:$0xff] %vm674_vm5, %v655_v2  ;;  %1504 = vmatprep.mubr.msk.f32.mxu1 %vm1010_vm9, %v997_v10 }
 0x164   : > { %681 = vst.msk [vmem:[#allocation2 + $0x30] sm:$0xff] %vm674_vm5, %v639_v8  ;;  %1492 = vmatprep.mubr.msk.f32.mxu0 %vm1010_vm9, %v989_v9 }
 0x166   : > { %v947_v11 = vpop.permute.xlu1 %946 }
 0x167   : > { %v931_v12 = vpop.permute.xlu0 %930  ;;  %982 = vst.msk [vmem:[#allocation2 + $0x68] sm:$0xff] %vm968_vm8, %v947_v11 }
 0x168   : > { %974 = vst.msk [vmem:[#allocation2 + $0x28] sm:$0xff] %vm968_vm8, %v931_v12 }
 0x16a   : > { %v657_v13 = vpop.permute.xlu1 %656 }
 0x16b   : > { %v641_v15 = vpop.permute.xlu0 %640  ;;  %690 = vst.msk [vmem:[#allocation2 + $0x78] sm:$0xff] %vm674_vm5, %v657_v13 }
 0x16c   : > { %682 = vst.msk [vmem:[#allocation2 + $0x38] sm:$0xff] %vm674_vm5, %v641_v15 }
 0x16e   : > { %v755_v14 = vpop.permute.xlu1 %754  ;;  %v998_v4 = vld [vmem:[#allocation2 + $0x68] sm:$0xff] }
 0x16f   : > { %v739_v16 = vpop.permute.xlu0 %738  ;;  %v990_v17 = vld [vmem:[#allocation2 + $0x28] sm:$0xff]  ;;  %789 = vst.msk [vmem:[#allocation2 + $0x70] sm:$0xff] %vm774_vm6, %v755_v14  ;;  %1505 = vmatmul.mubr.msk.f32.gmra.mxu1 %vm1010_vm9, %v998_v4 }
 0x170   : > { %781 = vst.msk [vmem:[#allocation2 + $0x30] sm:$0xff] %vm774_vm6, %v739_v16  ;;  %1493 = vmatmul.mubr.msk.f32.gmra.mxu0 %vm1010_vm9, %v990_v17 }
 0x172   : > { %v757_v18 = vpop.permute.xlu1 %756 }
 0x173   : > { %v741_v19 = vpop.permute.xlu0 %740  ;;  %790 = vst.msk [vmem:[#allocation2 + $0x78] sm:$0xff] %vm774_vm6, %v757_v18 }
 0x174   : > { %782 = vst.msk [vmem:[#allocation2 + $0x38] sm:$0xff] %vm774_vm6, %v741_v19 }
 0x176   : > { %v852_v6 = vpop.permute.xlu1 %851 }
 0x177   : > { %v836_v22 = vpop.permute.xlu0 %835  ;;  %886 = vst.msk [vmem:[#allocation2 + $0x70] sm:$0xff] %vm871_vm7, %v852_v6 }
 0x178   : > { %878 = vst.msk [vmem:[#allocation2 + $0x30] sm:$0xff] %vm871_vm7, %v836_v22 }
 0x17a   : > { %v854_v23 = vpop.permute.xlu1 %853 }
 0x17b   : > { %v838_v24 = vpop.permute.xlu0 %837  ;;  %887 = vst.msk [vmem:[#allocation2 + $0x78] sm:$0xff] %vm871_vm7, %v854_v23 }
 0x17c   : > { %879 = vst.msk [vmem:[#allocation2 + $0x38] sm:$0xff] %vm871_vm7, %v838_v24 }
 0x17e   : > { %v949_v25 = vpop.permute.xlu1 %948 }
 0x17f   : > { %v933_v27 = vpop.permute.xlu0 %932  ;;  %983 = vst.msk [vmem:[#allocation2 + $0x70] sm:$0xff] %vm968_vm8, %v949_v25 }
 0x180   : > { %975 = vst.msk [vmem:[#allocation2 + $0x30] sm:$0xff] %vm968_vm8, %v933_v27 }
 0x182   : > { %v951_v26 = vpop.permute.xlu1 %950 }
 0x183   : > { %v935_v29 = vpop.permute.xlu0 %934  ;;  %984 = vst.msk [vmem:[#allocation2 + $0x78] sm:$0xff] %vm968_vm8, %v951_v26 }
 0x184   : > { %976 = vst.msk [vmem:[#allocation2 + $0x38] sm:$0xff] %vm968_vm8, %v935_v29 }
 0x186   : > { %v999_v28 = vld [vmem:[#allocation2 + $0x70] sm:$0xff] }
 0x187   : > { %v991_v31 = vld [vmem:[#allocation2 + $0x30] sm:$0xff]  ;;  %1507 = vmatprep.mubr.msk.f32.mxu1 %vm1010_vm9, %v999_v28 }
 0x188   : > { %1495 = vmatprep.mubr.msk.f32.mxu0 %vm1010_vm9, %v991_v31 }
 0x18a   : > { %v1000_v33 = vld [vmem:[#allocation2 + $0x78] sm:$0xff] }
 0x18b   : > { %v992_v32 = vld [vmem:[#allocation2 + $0x38] sm:$0xff]  ;;  %1508 = vmatmul.mubr.msk.f32.gmra.mxu1 %vm1010_vm9, %v1000_v33 }
 0x18c   : > { %1496 = vmatmul.mubr.msk.f32.gmra.mxu0 %vm1010_vm9, %v992_v32 }
 0x1b3   : > { %v1488_v34 = vpop.f32.mrf.mxu0 }
 0x1b4   : > { %v1500_v30 = vpop.f32.mrf.mxu1  ;;  %1205 = vst.msk [vmem:[%s2161_s27 + $0x8] sm:$0xff] %vm186_vm0, %v1488_v34 }
 0x1b5   : > { %1213 = vst.msk [vmem:[%s2161_s27 + $0x48] sm:$0xff] %vm186_vm0, %v1500_v30  ;;  %v1125_v35 = vpop.f32.mrf.mxu0 }
 0x1b6   : > { %v1165_v36 = vpop.f32.mrf.mxu1  ;;  %1204 = vst.msk [vmem:[%s2161_s27] sm:$0xff] %vm186_vm0, %v1125_v35 }
 0x1b7   : > { %1212 = vst.msk [vmem:[%s2161_s27 + $0x40] sm:$0xff] %vm186_vm0, %v1165_v36 }
 0x1f3   : > { %v1491_v37 = vpop.f32.mrf.mxu0 }
 0x1f4   : > { %v1503_v38 = vpop.f32.mrf.mxu1  ;;  %1207 = vst.msk [vmem:[%s2161_s27 + $0x18] sm:$0xff] %vm186_vm0, %v1491_v37 }
 0x1f5   : > { %1215 = vst.msk [vmem:[%s2161_s27 + $0x58] sm:$0xff] %vm186_vm0, %v1503_v38  ;;  %v1135_v39 = vpop.f32.mrf.mxu0 }
 0x1f6   : > { %v1175_v40 = vpop.f32.mrf.mxu1  ;;  %1206 = vst.msk [vmem:[%s2161_s27 + $0x10] sm:$0xff] %vm186_vm0, %v1135_v39 }
 0x1f7   : > { %1214 = vst.msk [vmem:[%s2161_s27 + $0x50] sm:$0xff] %vm186_vm0, %v1175_v40 }
 0x22f   : > { %v1506_v42 = vpop.f32.mrf.mxu1 }
 0x230   : > { %v1494_v41 = vpop.f32.mrf.mxu0  ;;  %1217 = vst.msk [vmem:[%s2161_s27 + $0x68] sm:$0xff] %vm186_vm0, %v1506_v42 }
 0x231   : > { %1209 = vst.msk [vmem:[%s2161_s27 + $0x28] sm:$0xff] %vm186_vm0, %v1494_v41  ;;  %v1185_v44 = vpop.f32.mrf.mxu1 }
 0x232   : > { %v1145_v43 = vpop.f32.mrf.mxu0  ;;  %1216 = vst.msk [vmem:[%s2161_s27 + $0x60] sm:$0xff] %vm186_vm0, %v1185_v44 }
 0x233   : > { %1208 = vst.msk [vmem:[%s2161_s27 + $0x20] sm:$0xff] %vm186_vm0, %v1145_v43 }
 0x24b   : > { %v1509_v46 = vpop.f32.mrf.mxu1 }
 0x24c   : > { %v1497_v45 = vpop.f32.mrf.mxu0  ;;  %1219 = vst.msk [vmem:[%s2161_s27 + $0x78] sm:$0xff] %vm186_vm0, %v1509_v46 }
 0x24d   : > { %1211 = vst.msk [vmem:[%s2161_s27 + $0x38] sm:$0xff] %vm186_vm0, %v1497_v45  ;;  %v1195_v48 = vpop.f32.mrf.mxu1 }
 0x24e   : > { %v1155_v47 = vpop.f32.mrf.mxu0  ;;  %1218 = vst.msk [vmem:[%s2161_s27 + $0x70] sm:$0xff] %vm186_vm0, %v1195_v48 }
 0x24f   : > { %1210 = vst.msk [vmem:[%s2161_s27 + $0x30] sm:$0xff] %vm186_vm0, %v1155_v47 }
 0x250 PF: > { %s12_s13 = sadd.s32 1, %s1615_s13   ;;  %s2213_s9 = smov %s1607_s11 }
 0x251   : > { %p9_p7 = scmp.ge.s32.totalorder %s12_s13, 6   ;;  %s2214_s10 = smov %s1611_s12 }
 0x252   : > { %s2215_s11 = smov %s2218_s14  ;;  %s2216_s12 = smov %s2222_s15 }
 0x253   :  { %11 = sbr.rel (!%p9_p7) target bundleno = 3 (0x3), region = 61 }

</bundles_post_ra>
